<compile_context>
chip_gen: v7x
topology: tpu7x:2x2x1
jax: 0.10.0
libtpu: 0.0.40
codegen_flags: <defaults>
</compile_context>

<pallas_src>
import jax
import jax.numpy as jnp
from jax.experimental import pallas as pl
from jax.experimental.pallas import tpu as pltpu

# ---------------- module config (causal DTC block, stride 1) ----------------
INPUT_DIM = 32          # channels C
KERNEL_SIZE = 3
STRIDE = 1
DILATION = 1
CAUSAL_CONV = True
DROPOUT_RATE = 0.1      # eval mode -> identity
LORDER = (KERNEL_SIZE - 1) * DILATION        # causal left padding
BN_EPS = 1e-5
_HP = jax.lax.Precision.HIGHEST

# Packed-parameter rows: K*C (fused dw+pw1 weight) + C (pw2 weight) + 8 tail
_PROWS = KERNEL_SIZE * INPUT_DIM + INPUT_DIM + 8


# ------------------------------- Pallas kernel -------------------------------
def dtc_kernel(x_ref, p_ref, o_ref):
    """One block of `Bb` batch elements per grid step.

    x_ref : (Bb, T, C)       input (also the residual)
    p_ref : (_PROWS, C)      packed params:
                             rows [0, K*C)        = wd1 (depthwise taps * BN1
                                                    scale folded into W1^T *
                                                    BN2 scale, block-stacked)
                             rows [K*C, K*C+C)    = W2^T with BN3 scale folded
                             row  K*C+C           = t2' (dw bias/BN1/pw1 bias/
                                                    BN2 shifts pushed thru W1)
                             row  K*C+C+1         = t3' (pw2 bias + BN3 shift)
    o_ref : (Bb, T, C)       output
    """
    Bb, T, C = x_ref.shape
    K = KERNEL_SIZE

    # Hoisted parameter reads (single packed tile, one DMA per grid step).
    wd1 = p_ref[0:K * C, :]                        # (K*C, C)
    w2 = p_ref[K * C:K * C + C, :]                 # (C,   C)
    t2 = p_ref[K * C + C:K * C + C + 1, :]         # (1,   C)
    t3 = p_ref[K * C + C + 1:K * C + C + 2, :]     # (1,   C)

    xb = x_ref[...].astype(jnp.float32)            # (Bb, T, C)

    # Causal shifted copies, built purely from values (no VMEM scratch
    # round-trip):  shifted_j[b, t, :] = x[b, t - (K-1-j)*DILATION, :],
    # zeros for t < shift.
    zpad = jnp.zeros((Bb, LORDER, C), jnp.float32)
    xpad = jnp.concatenate([zpad, xb], axis=1)     # (Bb, T+LORDER, C)
    shifted = []
    for j in range(K):
        s = (K - 1 - j) * DILATION                 # causal shift (<= LORDER)
        shifted.append(xpad[:, LORDER - s:LORDER - s + T, :])
    # TODO(synk): pltpu.roll(xb, s, axis=1) + iota<shift mask would put the
    # shift on the XLU and avoid the sublane concat/slice; immaterial here.

    # Lane-concatenate the K shifted copies and flatten batch*time so that
    # depthwise conv + BN1 + pointwise-1 + BN2 collapse into ONE matmul.
    xcat = jnp.concatenate(shifted, axis=-1).reshape(Bb * T, K * C)

    # Fused depthwise + point_conv_1 (+ folded BN1/bias/BN2) + ReLU
    z = jnp.dot(xcat, wd1, preferred_element_type=jnp.float32, precision=_HP)
    z = jnp.maximum(z + t2, 0.0)

    # point_conv_2 (+ folded bias / BN3)
    u = jnp.dot(z, w2, preferred_element_type=jnp.float32, precision=_HP)
    u = u + t3

    # residual (stride == 1) + ReLU; dropout is identity in eval mode
    if STRIDE == 1:
        u = u + xb.reshape(Bb * T, C)
    o_ref[...] = jnp.maximum(u, 0.0).reshape(Bb, T, C).astype(o_ref.dtype)


# ------------------------- host-side parameter folding ------------------------
def _fold_params(params):
    """Exactly fold conv biases + inference-mode BatchNorm into the weights."""
    C, K = INPUT_DIM, KERNEL_SIZE

    def bn_fold(gamma, beta, mean, var):
        a = gamma / jnp.sqrt(var + BN_EPS)
        return a, beta - a * mean

    a1, b1 = bn_fold(*params["bn1"])
    a2, b2 = bn_fold(*params["bn2"])
    a3, b3 = bn_fold(*params["bn3"])

    # depthwise taps with BN1 scale folded in: tap'[j, c] = a1[c] * dw_w[c,0,j]
    taps = jnp.transpose(params["dw_w"][:, 0, :], (1, 0)) * a1[None, :]  # (K,C)
    # BN1 shift including the depthwise bias
    c1 = a1 * params["dw_b"] + b1
    # pointwise weights stored as (in, out) with BN2 / BN3 scales folded in
    w1t = jnp.transpose(params["pw1_w"][:, :, 0], (1, 0)) * a2[None, :]
    w2t = jnp.transpose(params["pw2_w"][:, :, 0], (1, 0)) * a3[None, :]
    # push the BN1 shift through pw1 and merge with pw1 bias + BN2 shift
    t2 = jnp.dot(c1, w1t, precision=_HP) + a2 * params["pw1_b"] + b2
    t3 = a3 * params["pw2_b"] + b3

    # Fold the depthwise taps into the first pointwise weight:
    #   wd1[j*C + c, o] = tap'_j[c] * w1t[c, o]      (block-stacked, (K*C, C))
    wd1 = (taps[:, :, None] * w1t[None, :, :]).reshape(K * C, C)

    P = jnp.zeros((_PROWS, C), jnp.float32)
    P = P.at[0:K * C].set(wd1)
    P = P.at[K * C:K * C + C].set(w2t)
    P = P.at[K * C + C].set(t2)
    P = P.at[K * C + C + 1].set(t3)
    return P


# --------------------------------- wrapper -----------------------------------
def _default_batch_block(B):
    # Single-TC v5e/v6e: one grid step (no per-step overhead).  Two-TC v7x:
    # two balanced "parallel" steps so both TensorCores get work.
    try:
        two_tc = "v7" in jax.devices()[0].device_kind.lower()
    except Exception:
        two_tc = False
    if two_tc and B >= 2 and B % 2 == 0:
        return B // 2
    return B


def dtc_block_forward(x, params, *, batch_block=None):
    """x: (B, T, C) float32 -> (B, T, C) float32 (eval-mode DTCBlock)."""
    B, T, C = x.shape
    assert C == INPUT_DIM and CAUSAL_CONV and STRIDE == 1

    P = _fold_params(params)

    if batch_block is None:
        batch_block = _default_batch_block(B)
    assert B % batch_block == 0
    grid = (B // batch_block,)

    # TODO(synk): on v7x, verify the "parallel" batch axis really shards
    # across both TensorCores (else pltpu.CORE_PARALLEL / pl.core_map); add a
    # time-tiling grid axis with an LORDER-row halo + lane-dense packing only
    # when B*T grows enough to matter (re-budget tiles for v7x's 64 MiB VMEM).
    return pl.pallas_call(
        dtc_kernel,
        out_shape=jax.ShapeDtypeStruct((B, T, C), x.dtype),
        grid_spec=pltpu.PrefetchScalarGridSpec(
            num_scalar_prefetch=0,
            grid=grid,
            in_specs=[
                pl.BlockSpec((batch_block, T, C), lambda i: (i, 0, 0)),  # x
                pl.BlockSpec((_PROWS, C), lambda i: (0, 0)),             # params
            ],
            out_specs=pl.BlockSpec((batch_block, T, C), lambda i: (i, 0, 0)),
        ),
        compiler_params=pltpu.CompilerParams(
            dimension_semantics=("parallel",)),
    )(x, P)


# --------------------------- plain-JAX reference ------------------------------
def dtc_block_reference(x, params):
    B, T, C = x.shape
    xt = jnp.transpose(x, (0, 2, 1))                       # (B, C, T)
    xp = jnp.pad(xt, ((0, 0), (0, 0), (LORDER, 0)))

    y = jax.lax.conv_general_dilated(
        xp, params["dw_w"], window_strides=(STRIDE,), padding="VALID",
        rhs_dilation=(DILATION,),
        dimension_numbers=("NCH", "OIH", "NCH"),
        feature_group_count=C, precision=_HP)
    y = y + params["dw_b"][None, :, None]

    def bn(v, g, be, m, va):
        return g[None, :, None] * (v - m[None, :, None]) / \
            jnp.sqrt(va[None, :, None] + BN_EPS) + be[None, :, None]

    y = bn(y, *params["bn1"])
    z = jnp.einsum("oc,bct->bot", params["pw1_w"][:, :, 0], y,
                   precision=_HP) + params["pw1_b"][None, :, None]
    z = jnp.maximum(bn(z, *params["bn2"]), 0.0)
    u = jnp.einsum("oc,bct->bot", params["pw2_w"][:, :, 0], z,
                   precision=_HP) + params["pw2_b"][None, :, None]
    u = bn(u, *params["bn3"])
    u = jnp.transpose(u, (0, 2, 1))
    if STRIDE == 1:
        u = u + x
    return jnp.maximum(u, 0.0)


# ----------------------------------- main -------------------------------------
if __name__ == "__main__":
    key = jax.random.PRNGKey(0)
    B, T, C = 2, 16, INPUT_DIM
    keys = jax.random.split(key, 10)

    x = jax.random.normal(keys[0], (B, T, C), jnp.float32)

    def bn_params(k):
        ka, kb, kc, kd = jax.random.split(k, 4)
        gamma = 1.0 + 0.1 * jax.random.normal(ka, (C,), jnp.float32)
        beta = 0.1 * jax.random.normal(kb, (C,), jnp.float32)
        mean = 0.1 * jax.random.normal(kc, (C,), jnp.float32)
        var = jnp.abs(1.0 + 0.1 * jax.random.normal(kd, (C,), jnp.float32))
        return (gamma, beta, mean, var)

    params = {
        "dw_w": 0.3 * jax.random.normal(keys[1], (C, 1, KERNEL_SIZE), jnp.float32),
        "dw_b": 0.1 * jax.random.normal(keys[2], (C,), jnp.float32),
        "pw1_w": (1.0 / jnp.sqrt(C)) * jax.random.normal(keys[3], (C, C, 1), jnp.float32),
        "pw1_b": 0.1 * jax.random.normal(keys[4], (C,), jnp.float32),
        "pw2_w": (1.0 / jnp.sqrt(C)) * jax.random.normal(keys[5], (C, C, 1), jnp.float32),
        "pw2_b": 0.1 * jax.random.normal(keys[6], (C,), jnp.float32),
        "bn1": bn_params(keys[7]),
        "bn2": bn_params(keys[8]),
        "bn3": bn_params(keys[9]),
    }

    out = jax.block_until_ready(dtc_block_forward(x, params))
    ref = jax.block_until_ready(dtc_block_reference(x, params))

    assert out.shape == (B, T, C) and out.dtype == jnp.float32
    max_err = float(jnp.max(jnp.abs(out - ref)))
    assert jnp.allclose(out, ref, rtol=1e-4, atol=1e-4), \
        f"max abs err {max_err}"
    print("KERNEL_OK")
</pallas_src>

<mosaic_0001>
module attributes {stable_mosaic.version = 11 : i64} {
  func.func @dtc_kernel(%arg0: i32, %arg1: memref<2x16x32xf32, #tpu.memory_space<vmem>>, %arg2: memref<136x32xf32, #tpu.memory_space<vmem>>, %arg3: memref<2x16x32xf32, #tpu.memory_space<vmem>>) attributes {dimension_semantics = [#tpu.dimension_semantics<parallel>], iteration_bounds = array<i64: 1>, scalar_prefetch = 0 : i64, scratch_operands = 0 : i64, tpu.core_type = #tpu.core_type<tc>, window_params = [{transform_indices = @transform_0, window_bounds = array<i64: 2, 16, 32>}, {pipeline_mode = #tpu.pipeline_mode<synchronous>, transform_indices = @transform_1, window_bounds = array<i64: 136, 32>}, {transform_indices = @transform_2, window_bounds = array<i64: 2, 16, 32>}]} {
    %c0 = arith.constant 0 : index
    %c0_0 = arith.constant 0 : index
    %0 = vector.load %arg2[%c0, %c0_0] : memref<136x32xf32, #tpu.memory_space<vmem>>, vector<96x32xf32>
    %c96 = arith.constant 96 : index
    %c0_1 = arith.constant 0 : index
    %1 = vector.load %arg2[%c96, %c0_1] : memref<136x32xf32, #tpu.memory_space<vmem>>, vector<32x32xf32>
    %c128 = arith.constant 128 : index
    %c0_2 = arith.constant 0 : index
    %2 = vector.load %arg2[%c128, %c0_2] : memref<136x32xf32, #tpu.memory_space<vmem>>, vector<1x32xf32>
    %c129 = arith.constant 129 : index
    %c0_3 = arith.constant 0 : index
    %3 = vector.load %arg2[%c129, %c0_3] : memref<136x32xf32, #tpu.memory_space<vmem>>, vector<1x32xf32>
    %c0_4 = arith.constant 0 : index
    %c0_5 = arith.constant 0 : index
    %c0_6 = arith.constant 0 : index
    %4 = vector.load %arg1[%c0_4, %c0_5, %c0_6] : memref<2x16x32xf32, #tpu.memory_space<vmem>>, vector<2x16x32xf32>
    %cst = arith.constant 0.000000e+00 : f32
    %5 = vector.broadcast %cst : f32 to vector<2x2x32xf32>
    %6 = tpu.concatenate %5, %4 in 1 : vector<2x2x32xf32>, vector<2x16x32xf32> -> vector<2x18x32xf32>
    %7 = vector.extract_strided_slice %6 {offsets = [0, 0, 0], sizes = [2, 16, 32], strides = [1, 1, 1]} : vector<2x18x32xf32> to vector<2x16x32xf32>
    %8 = vector.extract_strided_slice %6 {offsets = [0, 1, 0], sizes = [2, 16, 32], strides = [1, 1, 1]} : vector<2x18x32xf32> to vector<2x16x32xf32>
    %9 = vector.extract_strided_slice %6 {offsets = [0, 2, 0], sizes = [2, 16, 32], strides = [1, 1, 1]} : vector<2x18x32xf32> to vector<2x16x32xf32>
    %10 = tpu.concatenate %7, %8, %9 in 2 : vector<2x16x32xf32>, vector<2x16x32xf32>, vector<2x16x32xf32> -> vector<2x16x96xf32>
    %11 = vector.shape_cast %10 : vector<2x16x96xf32> to vector<32x96xf32>
    %cst_7 = arith.constant dense<0.000000e+00> : vector<32x32xf32>
    %12 = tpu.matmul %11, %0, %cst_7 {dimension_numbers = #tpu.dot_dimension_numbers<[1], [0], [0], [1], [0, 0, 1, 1], [], []>, precision = #tpu.contract_precision<fp32>} : vector<32x96xf32>, vector<96x32xf32>, vector<32x32xf32> -> vector<32x32xf32>
    %13 = vector.broadcast %2 : vector<1x32xf32> to vector<32x32xf32>
    %14 = arith.addf %12, %13 : vector<32x32xf32>
    %cst_8 = arith.constant 0.000000e+00 : f32
    %15 = vector.broadcast %cst_8 : f32 to vector<32x32xf32>
    %16 = arith.maximumf %14, %15 : vector<32x32xf32>
    %cst_9 = arith.constant dense<0.000000e+00> : vector<32x32xf32>
    %17 = tpu.matmul %16, %1, %cst_9 {dimension_numbers = #tpu.dot_dimension_numbers<[1], [0], [0], [1], [0, 0, 1, 1], [], []>, precision = #tpu.contract_precision<fp32>} : vector<32x32xf32>, vector<32x32xf32>, vector<32x32xf32> -> vector<32x32xf32>
    %18 = vector.broadcast %3 : vector<1x32xf32> to vector<32x32xf32>
    %19 = arith.addf %17, %18 : vector<32x32xf32>
    %20 = vector.shape_cast %4 : vector<2x16x32xf32> to vector<32x32xf32>
    %21 = arith.addf %19, %20 : vector<32x32xf32>
    %cst_10 = arith.constant 0.000000e+00 : f32
    %22 = vector.broadcast %cst_10 : f32 to vector<32x32xf32>
    %23 = arith.maximumf %21, %22 : vector<32x32xf32>
    %24 = vector.shape_cast %23 : vector<32x32xf32> to vector<2x16x32xf32>
    %c0_11 = arith.constant 0 : index
    %c0_12 = arith.constant 0 : index
    %c0_13 = arith.constant 0 : index
    %25 = vector.load %arg3[%c0_11, %c0_12, %c0_13] : memref<2x16x32xf32, #tpu.memory_space<vmem>>, vector<2x16x32xf32>
    tpu.vector_store %arg3[%c0_11, %c0_12, %c0_13], %24 {strides = array<i32>} : memref<2x16x32xf32, #tpu.memory_space<vmem>>, vector<2x16x32xf32>,
    return
  }
  func.func @transform_0(%arg0: i32) -> (i32, i32, i32) {
    %c0_i32 = arith.constant 0 : i32
    %c0_i32_0 = arith.constant 0 : i32
    %c0_i32_1 = arith.constant 0 : i32
    return %arg0, %c0_i32, %c0_i32_0 : i32, i32, i32
  }
  func.func @transform_1(%arg0: i32) -> (i32, i32) {
    %c0_i32 = arith.constant 0 : i32
    %c0_i32_0 = arith.constant 0 : i32
    %c0_i32_1 = arith.constant 0 : i32
    return %c0_i32, %c0_i32_0 : i32, i32
  }
  func.func @transform_2(%arg0: i32) -> (i32, i32, i32) {
    %c0_i32 = arith.constant 0 : i32
    %c0_i32_0 = arith.constant 0 : i32
    %c0_i32_1 = arith.constant 0 : i32
    return %arg0, %c0_i32, %c0_i32_0 : i32, i32, i32
  }
}

</mosaic_0001>

<bundles_post_ra>
// kernel: tpu_custom_call.1
= control target key start
LH: loop header
LB: loop body
LE: loop exit
PB: predicated region body
PF: predicated region fallthrough
CT: control target
= control target key end

     0   :  { %vm38_vm0 = vcmask 1041408   ;;  %vm53_vm1 = vcmask 1046528   ;;  %vm76_vm2 = vcmask 1045504   ;;  %s2565_s0 = inlined_call_operand.vmem [shape: f32[2,16,32], index: 0, kind: input, shape index: {}]   ;;  %s2566_s1 = inlined_call_operand.vmem [shape: f32[136,32], index: 1, kind: input, shape index: {}]   ;;  %s2567_s2 = inlined_call_operand.hbm [shape: f32[2,16,32], index: 2, kind: output, shape index: {}]  }
   0x1   :  { %v2208_v0 = vld [vmem:[%s2565_s0] sm:$0xff]  ;;  %v2213_v1 = vld [vmem:[%s2565_s0 + $0x8] sm:$0xff]  ;;  %v2220_v4 = vld [vmem:[%s2565_s0 + $0x10] sm:$0xff] }
   0x2   :  { %v39_v2 = vrot.slane %v2208_v0, 6  ;;  %v40_v3 = vrot.slane %v2213_v1, 6  ;;  %v2225_v5 = vld [vmem:[%s2565_s0 + $0x18] sm:$0xff]  ;;  %v12_v6 = vld [vmem:[%s2566_s1] sm:$0xff]  ;;  %v42_v7 = vrot.slane %v2220_v4, 6  ;;  %v13_v20 = vld [vmem:[%s2566_s1 + $0x8] sm:$0xff] }
   0x3   :  { %v2232_v8 = vrot.slane %v2225_v5, 6  ;;  %v127_v9 = vand.u32 4294901760, %v12_v6  ;;  %v14_v21 = vld [vmem:[%s2566_s1 + $0x10] sm:$0xff]  ;;  %v15_v22 = vld [vmem:[%s2566_s1 + $0x18] sm:$0xff] }
   0x4   :  { %v2235_v10 = vsel %vm38_vm0, %v39_v2, %v40_v3  ;;  %v2238_v11 = vsel %vm38_vm0, 0.0, %v39_v2  ;;  %v57_v12 = vrot.slane %v40_v3, 1  ;;  %v80_v13 = vrot.slane %v40_v3, 2 }
   0x5   :  { %v54_v14 = vrot.slane %v2238_v11, 1  ;;  %v55_v15 = vrot.slane %v2235_v10, 1  ;;  %v77_v16 = vrot.slane %v2238_v11, 2  ;;  %v78_v17 = vrot.slane %v2235_v10, 2 }
   0x6   :  { %v2246_v18 = vsel %vm38_vm0, %v42_v7, %v2232_v8  ;;  %v2249_v19 = vsel %vm38_vm0, 0.0, %v42_v7  ;;  %v62_v25 = vrot.slane %v2232_v8, 1 }
   0x7   :  { %v56_v23 = vsel %vm53_vm1, %v54_v14, %v55_v15  ;;  %v79_v24 = vsel %vm76_vm2, %v77_v16, %v78_v17 }
   0x8   :  { %7 = vsyncpa [#allocation3], 0  ;;  %s2185_s24 = smov 32   ;;  %s2186_s25 = smov 64   ;;  %v58_v26 = vsel %vm53_vm1, %v55_v15, %v57_v12  ;;  %v81_v27 = vsel %vm76_vm2, %v78_v17, %v80_v13  ;;  %v59_v28 = vrot.slane %v2249_v19, 1  ;;  %v60_v29 = vrot.slane %v2246_v18, 1 }
   0x9   :  { %64 = vrot.lane.b32.xlu0 %v56_v23, %s2185_s24  ;;  %87 = vrot.lane.b32.xlu1 %v79_v24, %s2186_s25  ;;  %v130_v30 = vand.u32 4294901760, %v13_v20  ;;  %v2269_v31 = vsub.f32 %v12_v6, %v127_v9  ;;  %v133_v32 = vand.u32 4294901760, %v14_v21  ;;  %v136_v33 = vand.u32 4294901760, %v15_v22  ;;  %v16_v34 = vld [vmem:[%s2566_s1 + $0x20] sm:$0xff]  ;;  %v17_v35 = vld [vmem:[%s2566_s1 + $0x28] sm:$0xff] }
   0xa   :  { %v18_v36 = vld [vmem:[%s2566_s1 + $0x30] sm:$0xff]  ;;  %v82_v37 = vrot.slane %v2249_v19, 2  ;;  %v83_v38 = vrot.slane %v2246_v18, 2  ;;  %v85_v39 = vrot.slane %v2232_v8, 2  ;;  %v19_v40 = vld [vmem:[%s2566_s1 + $0x38] sm:$0xff]  ;;  %v139_v46 = vand.u32 4294901760, %v16_v34 }
   0xb   :  { %v2286_v41 = vpack.c.bf16 %v130_v30, %v127_v9  ;;  %v2288_v42 = vsub.f32 %v13_v20, %v130_v30  ;;  %v2290_v43 = vpack.c.bf16 %v136_v33, %v133_v32  ;;  %v2292_v44 = vsub.f32 %v14_v21, %v133_v32  ;;  %v20_v53 = vld [vmem:[%s2566_s1 + $0x40] sm:$0xff]  ;;  %v21_v54 = vld [vmem:[%s2566_s1 + $0x48] sm:$0xff]  ;;  %v22_v55 = vld [vmem:[%s2566_s1 + $0x50] sm:$0xff] }
   0xc   :  { %v2296_v45 = vsub.f32 %v15_v22, %v136_v33  ;;  %v142_v47 = vand.u32 4294901760, %v17_v35  ;;  %v145_v48 = vand.u32 4294901760, %v18_v36  ;;  %v61_v49 = vsel %vm53_vm1, %v59_v28, %v60_v29  ;;  %v23_v60 = vld [vmem:[%s2566_s1 + $0x58] sm:$0xff] }
   0xd   :  { %66 = vrot.lane.b32.xlu0 %v58_v26, %s2185_s24  ;;  %89 = vrot.lane.b32.xlu1 %v81_v27, %s2186_s25  ;;  %v63_v50 = vsel %vm53_vm1, %v60_v29, %v62_v25  ;;  %v1964_v51 = vpack.c.bf16 %v2288_v42, %v2269_v31  ;;  %v148_v52 = vand.u32 4294901760, %v19_v40  ;;  %v84_v56 = vsel %vm76_vm2, %v82_v37, %v83_v38 }
   0xe   :  { %1917 = vmatprep.subr.bf16.mxu1 %v2286_v41  ;;  %v1968_v57 = vpack.c.bf16 %v2296_v45, %v2292_v44  ;;  %v2316_v58 = vsub.f32 %v16_v34, %v139_v46  ;;  %v2318_v59 = vsub.f32 %v17_v35, %v142_v47  ;;  %v2323_v61 = vpack.c.bf16 %v142_v47, %v139_v46 }
   0xf   :  { %1919 = vmatpush3.bf16.msra.mxu1 %v2286_v41  ;;  %1965 = vmatprep.subr.bf16.mxu0 %v1964_v51  ;;  %v2326_v62 = vsub.f32 %v18_v36, %v145_v48  ;;  %v2328_v63 = vsub.f32 %v19_v40, %v148_v52  ;;  %v86_v2 = vsel %vm76_vm2, %v83_v38, %v85_v39  ;;  %v151_v3 = vand.u32 4294901760, %v20_v53 }
  0x10   :  { %1921 = vmatprep.subr.bf16.mxu1 %v2290_v43  ;;  %v154_v6 = vand.u32 4294901760, %v21_v54  ;;  %v157_v7 = vand.u32 4294901760, %v22_v55  ;;  %1967 = vmatpush3.bf16.msra.mxu0 %v1964_v51  ;;  %v2333_v8 = vpack.c.bf16 %v148_v52, %v145_v48  ;;  %v160_v9 = vand.u32 4294901760, %v23_v60 }
  0x11   :  { %68 = vrot.lane.b32.xlu0 %v61_v49, %s2185_s24  ;;  %70 = vrot.lane.b32.xlu1 %v63_v50, %s2185_s24  ;;  %v246_v12 = vand.u32 4294901760, %v2269_v31  ;;  %v253_v13 = vand.u32 4294901760, %v2288_v42  ;;  %v1972_v14 = vpack.c.bf16 %v2318_v59, %v2316_v58  ;;  %v2340_v15 = vsub.f32 %v20_v53, %v151_v3 }
  0x12   :  { %1969 = vmatprep.subr.bf16.mxu0 %v1968_v57  ;;  %v2342_v16 = vsub.f32 %v21_v54, %v154_v6  ;;  %v260_v17 = vand.u32 4294901760, %v2292_v44  ;;  %v1976_v20 = vpack.c.bf16 %v2328_v63, %v2326_v62  ;;  %v2348_v21 = vpack.c.bf16 %v154_v6, %v151_v3 }
  0x13   :  { %1923 = vmatpush3.bf16.msra.mxu1 %v2290_v43  ;;  %v2350_v22 = vpack.c.bf16 %v160_v9, %v157_v7  ;;  %v247_v23 = vsub.f32 %v2269_v31, %v246_v12  ;;  %v2355_v24 = vsub.f32 %v22_v55, %v157_v7  ;;  %v254_v25 = vsub.f32 %v2288_v42, %v253_v13 }
  0x14   :  { %1925 = vmatprep.subr.bf16.mxu1 %v2323_v61  ;;  %v261_v26 = vsub.f32 %v2292_v44, %v260_v17  ;;  %v267_v27 = vand.u32 4294901760, %v2296_v45  ;;  %1971 = vmatpush3.bf16.msra.mxu0 %v1968_v57  ;;  %v1980_v28 = vpack.c.bf16 %v2342_v16, %v2340_v15  ;;  %v322_v29 = vsub.f32 %v23_v60, %v160_v9 }
  0x15   :  { %91 = vrot.lane.b32.xlu0 %v84_v56, %s2186_s25  ;;  %93 = vrot.lane.b32.xlu1 %v86_v2, %s2186_s25  ;;  %v274_v30 = vand.u32 4294901760, %v2316_v58  ;;  %v281_v31 = vand.u32 4294901760, %v2318_v59  ;;  %v248_v32 = vand.u32 4294901760, %v247_v23  ;;  %v288_v35 = vand.u32 4294901760, %v2326_v62  ;;  %s2187_s25 = smov [#allocation2]  }
  0x16   :  { %1973 = vmatprep.subr.bf16.mxu0 %v1972_v14  ;;  %v262_v33 = vand.u32 4294901760, %v261_v26  ;;  %v268_v34 = vsub.f32 %v2296_v45, %v267_v27  ;;  %v295_v38 = vand.u32 4294901760, %v2328_v63  ;;  %v302_v39 = vand.u32 4294901760, %v2340_v15  ;;  %s1495_s26 = sshll.u32 %s2187_s25, 4  ;;  %s1496_s26 = int_to_ptr.vmem [resolvable:$true] %s1495_s26 }
  0x17   :  { %1927 = vmatpush3.bf16.msra.mxu1 %v2323_v61  ;;  %v275_v36 = vsub.f32 %v2316_v58, %v274_v30  ;;  %v282_v37 = vsub.f32 %v2318_v59, %v281_v31  ;;  %v255_v40 = vand.u32 4294901760, %v254_v25  ;;  %v289_v44 = vsub.f32 %v2326_v62, %v288_v35  ;;  %p2166_p1 = scmp.lt.s32.totalorder %s1496_s26, %s1496_s26 }
  0x18   :  { %1929 = vmatprep.subr.bf16.mxu1 %v2333_v8  ;;  %v269_v42 = vand.u32 4294901760, %v268_v34  ;;  %v309_v46 = vand.u32 4294901760, %v2342_v16  ;;  %1975 = vmatpush3.bf16.msra.mxu0 %v1972_v14  ;;  %v296_v48 = vsub.f32 %v2328_v63, %v295_v38  ;;  %v303_v49 = vsub.f32 %v2340_v15, %v302_v39 }
  0x19   :  { %v276_v45 = vand.u32 4294901760, %v275_v36  ;;  %v283_v47 = vand.u32 4294901760, %v282_v37  ;;  %1977 = vmatprep.subr.bf16.mxu0 %v1976_v20  ;;  %v290_v51 = vand.u32 4294901760, %v289_v44  ;;  %v316_v53 = vand.u32 4294901760, %v2355_v24 }
  0x1a   :  { %v2377_v50 = vpack.c.bf16 %v269_v42, %v262_v33  ;;  %v310_v52 = vsub.f32 %v2342_v16, %v309_v46  ;;  %v297_v55 = vand.u32 4294901760, %v296_v48  ;;  %v304_v56 = vand.u32 4294901760, %v303_v49 }
  0x1b   :  { %1931 = vmatpush3.bf16.msra.mxu1 %v2333_v8  ;;  %v2382_v54 = vpack.c.bf16 %v283_v47, %v276_v45  ;;  %v323_v57 = vand.u32 4294901760, %v322_v29  ;;  %v2384_v59 = vpack.c.bf16 %v253_v13, %v246_v12  ;;  %v317_v60 = vsub.f32 %v2355_v24, %v316_v53 }
  0x1c   :  { %1933 = vmatprep.subr.bf16.mxu1 %v2348_v21  ;;  %v311_v58 = vand.u32 4294901760, %v310_v52  ;;  %1979 = vmatpush3.bf16.msra.mxu0 %v1976_v20  ;;  %v2387_v62 = vpack.c.bf16 %v297_v55, %v290_v51  ;;  %v1984_v2 = vpack.c.bf16 %v322_v29, %v2355_v24  ;;  %v1940_v7 = vpack.c.bf16 %v255_v40, %v248_v32 }
  0x1d   :  { %v324_v63 = vsub.f32 %v322_v29, %v323_v57  ;;  %1981 = vmatprep.subr.bf16.mxu0 %v1980_v28  ;;  %v318_v6 = vand.u32 4294901760, %v317_v60  ;;  %v2394_v12 = vpack.c.bf16 %v267_v27, %v260_v17  ;;  %v2399_v14 = vpack.c.bf16 %v281_v31, %v274_v30 }
  0x1e   :  { %v2391_v3 = vpack.c.bf16 %v311_v58, %v304_v56  ;;  %v2402_v15 = vpack.c.bf16 %v295_v38, %v288_v35  ;;  %v2404_v16 = vpack.c.bf16 %v309_v46, %v302_v39  ;;  %v2406_v20 = vpack.c.bf16 %v323_v57, %v316_v53 }
  0x1f   :  { %1935 = vmatpush3.bf16.msra.mxu1 %v2348_v21  ;;  %v325_v9 = vand.u32 4294901760, %v324_v63  ;;  %vm99_vm3 = vcmask 261120   ;;  %vm104_vm4 = vcmask 523264   ;;  %vm113_vm5 = vcmask 785408  }
  0x20   :  { %1937 = vmatprep.subr.bf16.mxu1 %v2350_v22  ;;  %1983 = vmatpush3.bf16.msra.mxu0 %v1980_v28 }
  0x21   :  { %v2396_v13 = vpack.c.bf16 %v325_v9, %v318_v6  ;;  %1985 = vmatprep.subr.bf16.mxu0 %v1984_v2 }
  0x23   :  { %1939 = vmatpush3.bf16.msra.mxu1 %v2350_v22 }
  0x24   :  { %1941 = vmatprep.subr.bf16.mxu1 %v1940_v7  ;;  %1987 = vmatpush3.bf16.msra.mxu0 %v1984_v2 }
  0x25   :  { %1989 = vmatprep.subr.bf16.mxu0 %v2286_v41 }
  0x7b   :  { %v65_v17 = vpop.permute.xlu0 %64  ;;  %v88_v23 = vpop.permute.xlu1 %87 }
  0x7c   :  { %v100_v24 = vsel %vm99_vm3, %v2238_v11, %v65_v17 }
  0x7d   :  { %v105_v25 = vsel %vm104_vm4, %v100_v24, %v88_v23 }
  0x7e   :  { %v115_v26 = vsel %vm113_vm5, %v105_v25, 0 }
  0x7f   :  { %v2412_v27 = vand.u32 4294901760, %v115_v26  ;;  %v67_v28 = vpop.permute.xlu0 %66  ;;  %v90_v29 = vpop.permute.xlu1 %89 }
  0x80   :  { %v101_v30 = vsel %vm99_vm3, %v2235_v10, %v67_v28 }
  0x81   :  { %v204_v31 = vsub.f32 %v115_v26, %v2412_v27  ;;  %v106_v32 = vsel %vm104_vm4, %v101_v30, %v90_v29 }
  0x82   :  { %v118_v33 = vsel %vm113_vm5, %v106_v32, 0 }
  0x83   :  { %v2419_v34 = vand.u32 4294901760, %v118_v33  ;;  %1736 = vmatprep.mubr.f32.mxu0 %v204_v31  ;;  %v69_v11 = vpop.permute.xlu0 %68  ;;  %v71_v35 = vpop.permute.xlu1 %70  ;;  %v205_v36 = vand.u32 4294901760, %v204_v31 }
  0x84   :  { %v102_v38 = vsel %vm99_vm3, %v2249_v19, %v69_v11  ;;  %v103_v10 = vsel %vm99_vm3, %v2246_v18, %v71_v35 }
  0x85   :  { %v214_v37 = vsub.f32 %v118_v33, %v2419_v34  ;;  %v206_v39 = vsub.f32 %v204_v31, %v205_v36 }
  0x87   :  { %v92_v40 = vpop.permute.xlu0 %91  ;;  %1737 = vmatmul.mubr.f32.vlgmr.msra.gmra.mrb[0].mxu0 %v214_v37  ;;  %v94_v42 = vpop.permute.xlu1 %93  ;;  %v207_v44 = vand.u32 4294901760, %v206_v39  ;;  %v215_v46 = vand.u32 4294901760, %v214_v37 }
  0x88   :  { %v107_v45 = vsel %vm104_vm4, %v102_v38, %v92_v40  ;;  %1991 = vmatpush3.bf16.msra.mxu0 %v2286_v41  ;;  %v108_v47 = vsel %vm104_vm4, %v103_v10, %v94_v42 }
  0x89   :  { %v121_v48 = vsel %vm113_vm5, %v107_v45, 0  ;;  %v124_v49 = vsel %vm113_vm5, %v108_v47, 0  ;;  %1676 = vmatprep.mubr.f32.mxu1 %v207_v44  ;;  %1993 = vmatprep.subr.bf16.mxu0 %v2290_v43  ;;  %v216_v18 = vsub.f32 %v214_v37, %v215_v46  ;;  %v1506_v37 = vld [vmem:[%s2566_s1 + $0x80] ss:$0 sm:$0xff] }
  0x8a   :  { %v2432_v19 = vand.u32 4294901760, %v121_v48  ;;  %v2434_v51 = vand.u32 4294901760, %v124_v49 }
  0x8b   :  { %v217_v52 = vand.u32 4294901760, %v216_v18 }
  0x8c   :  { %v224_v53 = vsub.f32 %v121_v48, %v2432_v19  ;;  %v234_v55 = vsub.f32 %v124_v49, %v2434_v51  ;;  %1995 = vmatpush3.bf16.msra.mxu0 %v2290_v43 }
  0x8d   :  { %1677 = vmatmul.mubr.f32.vlgmr.msra.gmra.mrb[0].mxu1 %v217_v52  ;;  %1997 = vmatprep.subr.bf16.mxu0 %v2323_v61 }
  0x8e   :  { %1943 = vmatpush3.bf16.msra.mxu1 %v1940_v7  ;;  %1739 = vmatprep.mubr.f32.mxu0 %v224_v53  ;;  %v225_v56 = vand.u32 4294901760, %v224_v53  ;;  %v235_v57 = vand.u32 4294901760, %v234_v55 }
  0x8f   :  { %1740 = vmatmul.mubr.f32.gmra.mrb[2].mxu0 %v234_v55  ;;  %1945 = vmatprep.subr.bf16.mxu1 %v2377_v50 }
  0x90   :  { %1999 = vmatpush3.bf16.msra.mxu0 %v2323_v61  ;;  %1766 = vmatprep.mubr.f32.mxu0 %v205_v36  ;;  %v226_v58 = vsub.f32 %v224_v53, %v225_v56  ;;  %v236_v60 = vsub.f32 %v234_v55, %v235_v57 }
  0x91   :  { %2001 = vmatprep.subr.bf16.mxu0 %v2333_v8 }
  0x92   :  { %1947 = vmatpush3.bf16.msra.mxu1 %v2377_v50  ;;  %v227_v63 = vand.u32 4294901760, %v226_v58  ;;  %v237_v2 = vand.u32 4294901760, %v236_v60 }
  0x93   :  { %1949 = vmatprep.subr.bf16.mxu1 %v2382_v54 }
  0x94   :  { %2003 = vmatpush3.bf16.msra.mxu0 %v2333_v8  ;;  %1679 = vmatprep.mubr.f32.mxu1 %v227_v63 }
  0x95   :  { %1680 = vmatmul.mubr.f32.gmra.mrb[2].mxu1 %v237_v2  ;;  %2005 = vmatprep.subr.bf16.mxu0 %v2348_v21 }
  0x96   :  { %1951 = vmatpush3.bf16.msra.mxu1 %v2382_v54  ;;  %1706 = vmatprep.mubr.f32.mxu1 %v2412_v27  ;;  %v26_v54 = vld [vmem:[%s2566_s1 + $0x70] sm:$0xff] }
  0x97   :  { %1953 = vmatprep.subr.bf16.mxu1 %v2387_v62 }
  0x98   :  { %2007 = vmatpush3.bf16.msra.mxu0 %v2348_v21 }
  0x99   :  { %2009 = vmatprep.subr.bf16.mxu0 %v2350_v22 }
  0x9a   :  { %1955 = vmatpush3.bf16.msra.mxu1 %v2387_v62  ;;  %v871_v62 = vand.u32 4294901760, %v26_v54 }
  0x9b   :  { %1957 = vmatprep.subr.bf16.mxu1 %v2391_v3 }
  0x9c   :  { %2011 = vmatpush3.bf16.msra.mxu0 %v2350_v22 }
  0x9d   :  { %2013 = vmatprep.subr.bf16.mxu0 %v2384_v59 }
  0x9e   :  { %1959 = vmatpush3.bf16.msra.mxu1 %v2391_v3 }
  0x9f   :  { %1767 = vmatmul.mubr.f32.vlgmr.msra.gmra.mrb[0].mxu0 %v215_v46  ;;  %1961 = vmatprep.subr.bf16.mxu1 %v2396_v13 }
  0xa0   :  { %1769 = vmatprep.mubr.f32.mxu0 %v225_v56  ;;  %2015 = vmatpush3.bf16.msra.mxu0 %v2384_v59  ;;  %v27_v59 = vld [vmem:[%s2566_s1 + $0x78] sm:$0xff] }
  0xa1   :  { %2017 = vmatprep.subr.bf16.mxu0 %v2394_v12  ;;  %v874_v3 = vand.u32 4294901760, %v27_v59 }
  0xa2   :  { %1963 = vmatpush3.bf16.msra.mxu1 %v2396_v13 }
  0xa3   :  { %1770 = vmatmul.mubr.f32.gmra.mrb[2].mxu0 %v235_v57  ;;  %v2509_v9 = vpack.c.bf16 %v874_v3, %v871_v62 }
  0xa4   :  { %2019 = vmatpush3.bf16.msra.mxu0 %v2394_v12  ;;  %1796 = vmatprep.mubr.f32.mxu0 %v2412_v27 }
  0xa5   :  { %1707 = vmatmul.mubr.f32.vlgmr.msra.gmra.mrb[0].mxu1 %v2419_v34  ;;  %2021 = vmatprep.subr.bf16.mxu0 %v2399_v14 }
  0xa6   :  { %1709 = vmatprep.mubr.f32.mxu1 %v2432_v19 }
  0xa8   :  { %2023 = vmatpush3.bf16.msra.mxu0 %v2399_v14  ;;  %v989_v14 = vsub.f32 %v26_v54, %v871_v62 }
  0xa9   :  { %1710 = vmatmul.mubr.f32.gmra.mrb[2].mxu1 %v2434_v51  ;;  %2025 = vmatprep.subr.bf16.mxu0 %v2402_v15 }
  0xaa   :  { %v990_v17 = vand.u32 4294901760, %v989_v14 }
  0xac   :  { %2027 = vmatpush3.bf16.msra.mxu0 %v2402_v15  ;;  %v996_v15 = vsub.f32 %v27_v59, %v874_v3  ;;  %v991_v25 = vsub.f32 %v989_v14, %v990_v17 }
  0xad   :  { %2029 = vmatprep.subr.bf16.mxu0 %v2404_v16 }
  0xae   :  { %v997_v23 = vand.u32 4294901760, %v996_v15  ;;  %v2080_v31 = vpack.c.bf16 %v996_v15, %v989_v14 }
  0xb0   :  { %2031 = vmatpush3.bf16.msra.mxu0 %v2404_v16  ;;  %v998_v26 = vsub.f32 %v996_v15, %v997_v23  ;;  %v2515_v33 = vpack.c.bf16 %v997_v23, %v990_v17 }
  0xb1   :  { %2033 = vmatprep.subr.bf16.mxu0 %v2406_v20 }
  0xb2   :  { %v999_v28 = vand.u32 4294901760, %v998_v26 }
  0xb4   :  { %2035 = vmatpush3.bf16.msra.mxu0 %v2406_v20 }
  0xb5   :  { %2037 = vmatprep.subr.bf16.mxu0 %v2286_v41 }
  0xb7   :  { %1797 = vmatmul.mubr.f32.vlgmr.msra.gmra.mrb[0].mxu0 %v2419_v34 }
  0xb8   :  { %1799 = vmatprep.mubr.f32.mxu0 %v2432_v19  ;;  %2039 = vmatpush3.bf16.msra.mxu0 %v2286_v41  ;;  %v24_v41 = vld [vmem:[%s2566_s1 + $0x60] sm:$0xff] }
  0xb9   :  { %2041 = vmatprep.subr.bf16.mxu0 %v2290_v43 }
  0xbb   :  { %1800 = vmatmul.mubr.f32.gmra.mrb[2].mxu0 %v2434_v51 }
  0xbc   :  { %2043 = vmatpush3.bf16.msra.mxu0 %v2290_v43  ;;  %1826 = vmatprep.mubr.f32.mxu0 %v2412_v27  ;;  %v25_v43 = vld [vmem:[%s2566_s1 + $0x68] sm:$0xff]  ;;  %v992_v27 = vand.u32 4294901760, %v991_v25 }
  0xbd   :  { %2045 = vmatprep.subr.bf16.mxu0 %v2323_v61 }
  0xbe   :  { %v2072_v29 = vpack.c.bf16 %v999_v28, %v992_v27 }
  0xc0   :  { %2047 = vmatpush3.bf16.msra.mxu0 %v2323_v61  ;;  %v865_v61 = vand.u32 4294901760, %v24_v41 }
  0xc1   :  { %2049 = vmatprep.subr.bf16.mxu0 %v2333_v8 }
  0xc2   :  { %v975_v50 = vsub.f32 %v24_v41, %v865_v61 }
  0xc4   :  { %2051 = vmatpush3.bf16.msra.mxu0 %v2333_v8  ;;  %v868_v8 = vand.u32 4294901760, %v25_v43  ;;  %v976_v6 = vand.u32 4294901760, %v975_v50 }
  0xc5   :  { %2053 = vmatprep.subr.bf16.mxu0 %v2348_v21 }
  0xc6   :  { %v977_v12 = vsub.f32 %v975_v50, %v976_v6 }
  0xc8   :  { %2055 = vmatpush3.bf16.msra.mxu0 %v2348_v21  ;;  %v2499_v21 = vpack.c.bf16 %v868_v8, %v865_v61  ;;  %v978_v16 = vand.u32 4294901760, %v977_v12 }
  0xc9   :  { %2057 = vmatprep.subr.bf16.mxu0 %v2350_v22 }
  0xca   :  { %2061 = vmatprep.subr.bf16.mxu1 %v2499_v21 }
  0xcb   :  { %2063 = vmatpush3.bf16.msra.mxu1 %v2499_v21 }
  0xcc   :  { %2059 = vmatpush3.bf16.msra.mxu0 %v2350_v22  ;;  %v982_v22 = vsub.f32 %v25_v43, %v868_v8  ;;  %2065 = vmatprep.subr.bf16.mxu1 %v2509_v9 }
  0xce   :  { %v983_v7 = vand.u32 4294901760, %v982_v22  ;;  %v2076_v30 = vpack.c.bf16 %v982_v22, %v975_v50 }
  0xcf   :  { %1827 = vmatmul.mubr.f32.vlgmr.msra.gmra.mrb[0].mxu0 %v2419_v34  ;;  %2067 = vmatpush3.bf16.msra.mxu1 %v2509_v9 }
  0xd0   :  { %1829 = vmatprep.mubr.f32.mxu0 %v2432_v19  ;;  %v984_v13 = vsub.f32 %v982_v22, %v983_v7  ;;  %v2513_v32 = vpack.c.bf16 %v983_v7, %v976_v6 }
  0xd2   :  { %v985_v20 = vand.u32 4294901760, %v984_v13 }
  0xd3   :  { %1830 = vmatmul.mubr.f32.gmra.mrb[2].mxu0 %v2434_v51 }
  0xd4   :  { %v2068_v24 = vpack.c.bf16 %v985_v20, %v978_v16  ;;  %v1507_v20 = vld [vmem:[%s2566_s1 + $0x81] ss:$0 sm:$0xff]  ;;  %s2161_s1 = scalar_lea.vmem %s1496_s26, 512 }
  0xd5   :  { %p2162_p0 = scmp.ne.s32.totalorder %s1496_s26, %s2161_s1  ;;  %p2167_p2 = scmp.lt.s32.totalorder %s2161_s1, %s2161_s1 }
  0xd6   :  { %2069 = vmatprep.subr.bf16.mxu1 %v2068_v24 }
  0xd7   :  { %p2168_p3 = por %p2167_p2, %p2166_p1 }
  0xd9   :  { %p2169_p4 = pnand %p2168_p3, %p2162_p0 }
 0x178   :  { %v1708_v34 = vpop.f32.mrb[0].mxu1 }
 0x179   :  { %v370_v11 = vpop.f32.mrb[1].mxu1  ;;  %v2108_v38 = vadd.f32 %v1708_v34, %v1506_v37 }
 0x17a   :  { %v2110_v10 = vadd.f32 %v1506_v37, %v370_v11 }
 0x17c   :  { %v1711_v35 = vpop.f32.mrb[2].mxu1 }
 0x17d   :  { %v382_v36 = vpop.f32.mrb[3].mxu1  ;;  %v2112_v46 = vadd.f32 %v1711_v35, %v1506_v37 }
 0x17e   :  { %v2114_v47 = vadd.f32 %v1506_v37, %v382_v36 }
 0x1a2   :  { %v1828_v39 = vpop.f32.mrb[0].mxu0 }
 0x1a3   :  { %v2109_v40 = vadd.f32 %v2108_v38, %v1828_v39  ;;  %v822_v42 = vpop.f32.mrb[1].mxu0 }
 0x1a4   :  { %v2111_v44 = vadd.f32 %v2110_v10, %v822_v42 }
 0x1a5   :  { %v845_v45 = vmax.f32 %v2109_v40, 0.0 }
 0x1a6   :  { %v844_v48 = vmax.f32 %v2111_v44, 0.0  ;;  %v1831_v49 = vpop.f32.mrb[2].mxu0 }
 0x1a7   :  { %v856_v18 = vsel %vm99_vm3, %v845_v45, 0  ;;  %v2113_v19 = vadd.f32 %v2112_v46, %v1831_v49  ;;  %v834_v51 = vpop.f32.mrb[3].mxu0 }
 0x1a8   :  { %v2521_v52 = vand.u32 4294901760, %v856_v18  ;;  %v853_v53 = vsel %vm99_vm3, %v844_v48, 0  ;;  %v2115_v55 = vadd.f32 %v2114_v47, %v834_v51 }
 0x1a9   :  { %v933_v56 = vand.u32 4294901760, %v853_v53  ;;  %v847_v57 = vmax.f32 %v2113_v19, 0.0 }
 0x1aa   :  { %v944_v58 = vsub.f32 %v856_v18, %v2521_v52  ;;  %v846_v60 = vmax.f32 %v2115_v55, 0.0 }
 0x1ab   :  { %v934_v63 = vsub.f32 %v853_v53, %v933_v56  ;;  %v862_v2 = vsel %vm99_vm3, %v847_v57, 0 }
 0x1ac   :  { %v945_v41 = vand.u32 4294901760, %v944_v58  ;;  %v963_v43 = vand.u32 4294901760, %v862_v2  ;;  %v859_v61 = vsel %vm99_vm3, %v846_v60, 0 }
 0x1ad   :  { %v953_v8 = vand.u32 4294901760, %v859_v61  ;;  %v935_v50 = vand.u32 4294901760, %v934_v63 }
 0x1ae   :  { %v946_v22 = vsub.f32 %v944_v58, %v945_v41  ;;  %v964_v54 = vsub.f32 %v862_v2, %v963_v43 }
 0x1af   :  { %v954_v59 = vsub.f32 %v859_v61, %v953_v8  ;;  %v936_v62 = vsub.f32 %v934_v63, %v935_v50 }
 0x1b0   :  { %v965_v3 = vand.u32 4294901760, %v964_v54  ;;  %v947_v12 = vand.u32 4294901760, %v946_v22 }
 0x1b1   :  { %v937_v6 = vand.u32 4294901760, %v936_v62  ;;  %v955_v7 = vand.u32 4294901760, %v954_v59 }
 0x1b2   :  { %v966_v13 = vsub.f32 %v964_v54, %v965_v3 }
 0x1b3   :  { %1840 = vmatprep.mubr.f32.mxu1 %v937_v6  ;;  %v956_v14 = vsub.f32 %v954_v59, %v955_v7 }
 0x1b4   :  { %1841 = vmatmul.mubr.f32.vlgmr.msra.gmra.mrb[4].mxu1 %v947_v12  ;;  %v967_v16 = vand.u32 4294901760, %v966_v13 }
 0x1b5   :  { %2071 = vmatpush3.bf16.msra.mxu1 %v2068_v24  ;;  %v957_v15 = vand.u32 4294901760, %v956_v14 }
 0x1b6   :  { %2073 = vmatprep.subr.bf16.mxu1 %v2072_v29 }
 0x1b7   :  { %1843 = vmatprep.mubr.f32.mxu1 %v957_v15 }
 0x1b8   :  { %1844 = vmatmul.mubr.f32.gmra.mrb[6].mxu1 %v967_v16 }
 0x1b9   :  { %2075 = vmatpush3.bf16.msra.mxu1 %v2072_v29  ;;  %1854 = vmatprep.mubr.f32.mxu1 %v933_v56 }
 0x1ba   :  { %2077 = vmatprep.subr.bf16.mxu1 %v2076_v30 }
 0x1bc   :  { %1855 = vmatmul.mubr.f32.vlgmr.msra.gmra.mrb[4].mxu1 %v2521_v52 }
 0x1bd   :  { %2079 = vmatpush3.bf16.msra.mxu1 %v2076_v30  ;;  %1857 = vmatprep.mubr.f32.mxu1 %v953_v8 }
 0x1be   :  { %2081 = vmatprep.subr.bf16.mxu1 %v2080_v31 }
 0x1c0   :  { %1858 = vmatmul.mubr.f32.gmra.mrb[6].mxu1 %v963_v43 }
 0x1c1   :  { %2083 = vmatpush3.bf16.msra.mxu1 %v2080_v31  ;;  %1868 = vmatprep.mubr.f32.mxu1 %v934_v63 }
 0x1c2   :  { %2085 = vmatprep.subr.bf16.mxu1 %v2499_v21 }
 0x1c4   :  { %1869 = vmatmul.mubr.f32.vlgmr.msra.gmra.mrb[4].mxu1 %v944_v58 }
 0x1c5   :  { %2087 = vmatpush3.bf16.msra.mxu1 %v2499_v21  ;;  %1871 = vmatprep.mubr.f32.mxu1 %v954_v59 }
 0x1c6   :  { %2089 = vmatprep.subr.bf16.mxu1 %v2509_v9 }
 0x1c8   :  { %1872 = vmatmul.mubr.f32.gmra.mrb[6].mxu1 %v964_v54 }
 0x1c9   :  { %2091 = vmatpush3.bf16.msra.mxu1 %v2509_v9  ;;  %1882 = vmatprep.mubr.f32.mxu1 %v935_v50 }
 0x1ca   :  { %2093 = vmatprep.subr.bf16.mxu1 %v2513_v32 }
 0x1cc   :  { %1883 = vmatmul.mubr.f32.vlgmr.msra.gmra.mrb[4].mxu1 %v945_v41 }
 0x1cd   :  { %2095 = vmatpush3.bf16.msra.mxu1 %v2513_v32  ;;  %1885 = vmatprep.mubr.f32.mxu1 %v955_v7 }
 0x1ce   :  { %2097 = vmatprep.subr.bf16.mxu1 %v2515_v33 }
 0x1d0   :  { %1886 = vmatmul.mubr.f32.gmra.mrb[6].mxu1 %v965_v3 }
 0x1d1   :  { %2099 = vmatpush3.bf16.msra.mxu1 %v2515_v33  ;;  %1896 = vmatprep.mubr.f32.mxu1 %v933_v56 }
 0x1d2   :  { %2101 = vmatprep.subr.bf16.mxu1 %v2499_v21 }
 0x1d4   :  { %1897 = vmatmul.mubr.f32.vlgmr.msra.gmra.mrb[4].mxu1 %v2521_v52 }
 0x1d5   :  { %2103 = vmatpush3.bf16.msra.mxu1 %v2499_v21  ;;  %1899 = vmatprep.mubr.f32.mxu1 %v953_v8 }
 0x1d6   :  { %2105 = vmatprep.subr.bf16.mxu1 %v2509_v9 }
 0x1d8   :  { %1900 = vmatmul.mubr.f32.gmra.mrb[6].mxu1 %v963_v43 }
 0x1d9   :  { %2107 = vmatpush3.bf16.msra.mxu1 %v2509_v9  ;;  %1910 = vmatprep.mubr.f32.mxu1 %v933_v56 }
 0x1dc   :  { %1911 = vmatmul.mubr.f32.vlgmr.msra.gmra.mrb[4].mxu1 %v2521_v52 }
 0x1dd   :  { %1913 = vmatprep.mubr.f32.mxu1 %v953_v8 }
 0x1e0   :  { %1914 = vmatmul.mubr.f32.gmra.mrb[6].mxu1 %v963_v43 }
 0x2af   :  { %v1912_v17 = vpop.f32.mrb[4].mxu1 }
 0x2b0   :  { %v2116_v23 = vadd.f32 %v1912_v17, %v1507_v20  ;;  %v1456_v24 = vpop.f32.mrb[5].mxu1 }
 0x2b1   :  { %v2117_v25 = vadd.f32 %v1507_v20, %v1456_v24 }
 0x2b2   :  { %v1479_v21 = vadd.f32 %v2116_v23, %v2213_v1 }
 0x2b3   :  { %v1478_v26 = vadd.f32 %v2117_v25, %v2208_v0  ;;  %v1915_v27 = vpop.f32.mrb[6].mxu1 }
 0x2b4   :  { %v1483_v28 = vmax.f32 %v1479_v21, 0.0  ;;  %v2118_v9 = vadd.f32 %v1915_v27, %v1507_v20  ;;  %v1468_v29 = vpop.f32.mrb[7].mxu1 }
 0x2b5   :  { %v1482_v30 = vmax.f32 %v1478_v26, 0.0  ;;  %v2119_v31 = vadd.f32 %v1507_v20, %v1468_v29 }
 0x2b6   :  { %1487 = vst.msk [vmem:[#allocation2 + $0x8] sm:$0xff] %vm99_vm3, %v1483_v28  ;;  %v1481_v32 = vadd.f32 %v2118_v9, %v2225_v5 }
 0x2b7   :  { %1486 = vst.msk [vmem:[#allocation2] sm:$0xff] %vm99_vm3, %v1482_v30  ;;  %v1480_v33 = vadd.f32 %v2119_v31, %v2220_v4 }
 0x2b8   :  { %v1485_v34 = vmax.f32 %v1481_v32, 0.0 }
 0x2b9   :  { %v1484_v1 = vmax.f32 %v1480_v33, 0.0 }
 0x2ba   :  { %1489 = vst.msk [vmem:[#allocation2 + $0x18] sm:$0xff] %vm99_vm3, %v1485_v34 }
 0x2bb   :  { %1488 = vst.msk [vmem:[#allocation2 + $0x10] sm:$0xff] %vm99_vm3, %v1484_v1 }
 0x2bc   :  { %2172 = shalt.err (!%p2169_p4)
}
 0x2bd   :  { %s2173_s29 = scalar_lea.hbm %s2567_s2, 512 }
 0x2be   :  { %p2174_p5 = scmp.ne.s32.totalorder %s2567_s2, %s2173_s29  ;;  %p2177_p6 = scmp.lt.u32.totalorder %s2173_s29, %s2567_s2 }
 0x2c0   :  { %p2179_p7 = pnand %p2177_p6, %p2174_p5 }
 0x2c2   :  { %2182 = shalt.err (!%p2179_p7)
}
 0x2c3   :  { %s2188_s6 = smov 128   ;;  %s2189_s7 = smov 8  }
 0x2c4   :  { %1501 = dma.vmem_to_hbm [thread:$0]  %s1496_s26, 512, %s2567_s2, [#allocation3], %s2188_s6, %s2188_s6, %s2189_s7  }
 0x2c5   :  { %2183 = dma.done.wait [#allocation3], 512  }
 0x2c6   :  { %2184 = vsyncadd [#allocation3], 4294966784 }
 0x2c7   :  { %1505 = vsyncpa [#allocation3], 1 }

</bundles_post_ra>
